<compile_context>
chip_gen: v7x
topology: tpu7x:2x2x1
jax: 0.10.0
libtpu: 0.0.40
codegen_flags: <defaults>
</compile_context>

<pallas_src>
import jax
import jax.numpy as jnp
from jax.experimental import pallas as pl
from jax.experimental.pallas import tpu as pltpu

BIAS_CONST = 0.9            # module-level `bias` in the PyTorch file
LANES = 128                 # TPU vreg lane width
TILE_R = 2048               # rows per grid step: 2048*128*4B = 1 MiB/tile
_PALLAS_MIN_ELEMENTS = 16 * 1024   # below this, plain jnp (overhead-dominated)


def _linear_kernel(w_ref, x_ref, o_ref):
    # w_ref: SMEM scalar weight (shape (1,)); x_ref/o_ref: (tile_r, 128) VMEM tiles.
    o_ref[...] = w_ref[0] * x_ref[...] + jnp.float32(BIAS_CONST)


def linear_model_forward(x: jax.Array, weights: jax.Array,
                         *, force_pallas: bool = False) -> jax.Array:
    """weights: shape (1,) float32 parameter; x: any float32 shape."""
    orig_shape = x.shape
    n = x.size

    # Tiny-input fast path: one grid step + launch overhead is 100% overhead
    # for a handful of floats; let XLA fuse the scalar mul-add instead.
    if n < _PALLAS_MIN_ELEMENTS and not force_pallas:
        return weights[0] * x + jnp.float32(BIAS_CONST)

    # --- lane-dense repack: flatten, pad, view as (padded_rows, 128) ---------
    rows = max(1, (n + LANES - 1) // LANES)
    tile_r = min(TILE_R, rows)
    padded_rows = ((rows + tile_r - 1) // tile_r) * tile_r
    total = padded_rows * LANES

    flat = x.reshape(-1)
    if total != n:
        flat = jnp.pad(flat, (0, total - n))          # pad value irrelevant; sliced off
    slab = flat.reshape(padded_rows, LANES)
    # Block shape is either a multiple of (8,128)-friendly (tile_r, 128) with
    # tile_r == TILE_R (divisible by 8), or equals the full array dims when
    # rows <= TILE_R — both satisfy the TPU tiling constraint.

    out_slab = pl.pallas_call(
        _linear_kernel,
        out_shape=jax.ShapeDtypeStruct((padded_rows, LANES), slab.dtype),
        grid=(padded_rows // tile_r,),
        in_specs=[
            pl.BlockSpec(memory_space=pltpu.SMEM),             # scalar weight, whole array
            pl.BlockSpec((tile_r, LANES), lambda i: (i, 0)),   # row tile of x
        ],
        out_specs=pl.BlockSpec((tile_r, LANES), lambda i: (i, 0)),
        compiler_params=pltpu.CompilerParams(
            dimension_semantics=("parallel",),                 # v7x: shard rows over 2 TCs
        ),
    )(weights, slab)

    return out_slab.reshape(-1)[:n].reshape(orig_shape)


if __name__ == "__main__":
    key = jax.random.PRNGKey(0)
    k_w, k_b, k_x1, k_x2 = jax.random.split(key, 4)

    # Deterministic parameter init (mirrors torch.randn(1) shapes).
    weights = jax.random.normal(k_w, (1,), dtype=jnp.float32)
    self_bias = jax.random.normal(k_b, (1,), dtype=jnp.float32)  # unused in forward, as in PyTorch

    # 1) Small linear-regression style input (N, 1), forced through the Pallas
    #    kernel (single (1, 128) full-array block).
    x_small = jax.random.normal(k_x1, (8, 1), dtype=jnp.float32)
    out_small = jax.block_until_ready(
        linear_model_forward(x_small, weights, force_pallas=True))
    ref_small = weights[0] * x_small + BIAS_CONST
    assert out_small.shape == x_small.shape and out_small.dtype == x_small.dtype
    assert jnp.allclose(out_small, ref_small, atol=1e-6, rtol=1e-6)

    # 1b) Same input through the tiny-input fast path (production routing).
    out_fast = jax.block_until_ready(linear_model_forward(x_small, weights))
    assert jnp.allclose(out_fast, ref_small, atol=1e-6, rtol=1e-6)

    # 2) Modestly larger input: (2048, 1) -> (16, 128) slab, single-tile
    #    Pallas dispatch with lane-dense stores.
    x_med = jax.random.normal(k_x2, (2048, 1), dtype=jnp.float32)
    out_med = jax.block_until_ready(
        linear_model_forward(x_med, weights, force_pallas=True))
    ref_med = weights[0] * x_med + BIAS_CONST
    assert out_med.shape == x_med.shape and out_med.dtype == x_med.dtype
    assert jnp.allclose(out_med, ref_med, atol=1e-6, rtol=1e-6)

    print("KERNEL_OK")
</pallas_src>

<mosaic_0001>
module attributes {stable_mosaic.version = 11 : i64} {
  func.func @_linear_kernel(%arg0: i32, %arg1: memref<1xf32, #tpu.memory_space<smem>>, %arg2: memref<1x128xf32, #tpu.memory_space<vmem>>, %arg3: memref<1x128xf32, #tpu.memory_space<vmem>>) attributes {dimension_semantics = [#tpu.dimension_semantics<parallel>], iteration_bounds = array<i64: 1>, scalar_prefetch = 0 : i64, scratch_operands = 0 : i64, tpu.core_type = #tpu.core_type<tc>, window_params = [{transform_indices = @transform_0, window_bounds = array<i64: 1>}, {transform_indices = @transform_1, window_bounds = array<i64: 1, 128>}, {transform_indices = @transform_2, window_bounds = array<i64: 1, 128>}]} {
    %c0 = arith.constant 0 : index
    %0 = memref.load %arg1[%c0] : memref<1xf32, #tpu.memory_space<smem>>
    %c0_0 = arith.constant 0 : index
    %c0_1 = arith.constant 0 : index
    %1 = vector.load %arg2[%c0_0, %c0_1] : memref<1x128xf32, #tpu.memory_space<vmem>>, vector<1x128xf32>
    %2 = vector.broadcast %0 : f32 to vector<1x128xf32>
    %3 = arith.mulf %2, %1 : vector<1x128xf32>
    %cst = arith.constant 0.899999976 : f32
    %4 = vector.broadcast %cst : f32 to vector<1x128xf32>
    %5 = arith.addf %3, %4 : vector<1x128xf32>
    %c0_2 = arith.constant 0 : index
    %c0_3 = arith.constant 0 : index
    %6 = vector.load %arg3[%c0_2, %c0_3] : memref<1x128xf32, #tpu.memory_space<vmem>>, vector<1x128xf32>
    tpu.vector_store %arg3[%c0_2, %c0_3], %5 {strides = array<i32>} : memref<1x128xf32, #tpu.memory_space<vmem>>, vector<1x128xf32>,
    return
  }
  func.func @transform_0(%arg0: i32) -> i32 {
    %c0_i32 = arith.constant 0 : i32
    %c0_i32_0 = arith.constant 0 : i32
    return %c0_i32 : i32
  }
  func.func @transform_1(%arg0: i32) -> (i32, i32) {
    %c0_i32 = arith.constant 0 : i32
    %c0_i32_0 = arith.constant 0 : i32
    return %arg0, %c0_i32 : i32, i32
  }
  func.func @transform_2(%arg0: i32) -> (i32, i32) {
    %c0_i32 = arith.constant 0 : i32
    %c0_i32_0 = arith.constant 0 : i32
    return %arg0, %c0_i32 : i32, i32
  }
}

</mosaic_0001>

<bundles_post_ra>
// kernel: tpu_custom_call.1
= control target key start
LH: loop header
LB: loop body
LE: loop exit
PB: predicated region body
PF: predicated region fallthrough
CT: control target
= control target key end

     0   :  { %s92_s0 = inlined_call_operand.<no memory space> [shape: f32[1], index: 0, kind: input, shape index: {}]   ;;  %s93_s1 = inlined_call_operand.vmem [shape: f32[1,128], index: 1, kind: input, shape index: {}]   ;;  %s94_s2 = inlined_call_operand.hbm [shape: f32[1,128], index: 2, kind: output, shape index: {}]  }
   0x1   :  { %v14_v0 = vld [vmem:[%s93_s1] sm:$0x1]  ;;  %v15_v1 = vstv %s92_s0 }
   0x2   :  { %8 = vsyncpa [#allocation4], 0  ;;  %v16_v2 = vmul.f32 %v15_v1, %v14_v0  ;;  %s58_s13 = smov [#allocation3]  }
   0x3   :  { %s25_s14 = sshll.u32 %s58_s13, 4  ;;  %s26_s14 = int_to_ptr.vmem [resolvable:$true] %s25_s14 }
   0x4   :  { %v17_v3 = vadd.f32 0.9, %v16_v2  ;;  %s34_s15 = scalar_lea.vmem %s26_s14, 16  ;;  %s38_s16 = scalar_lea.vmem %s26_s14, 32 }
   0x5   :  { %p35_p0 = scmp.ne.s32.totalorder %s26_s14, %s34_s15  ;;  %p39_p1 = scmp.lt.s32.totalorder %s26_s14, %s26_s14 }
   0x6   :  { %18 = vst [vmem:[#allocation3] sm:$0x1] %v17_v3  ;;  %p40_p2 = scmp.lt.s32.totalorder %s38_s16, %s34_s15 }
   0x8   :  { %p41_p3 = por %p40_p2, %p39_p1 }
   0xa   :  { %p42_p4 = pnand %p41_p3, %p35_p0 }
   0xc   :  { %45 = shalt.err (!%p42_p4)
}
   0xd   :  { %s46_s18 = scalar_lea.hbm %s94_s2, 16 }
   0xe   :  { %p47_p5 = scmp.ne.s32.totalorder %s94_s2, %s46_s18  ;;  %p50_p6 = scmp.lt.u32.totalorder %s46_s18, %s94_s2 }
  0x10   :  { %p52_p7 = pnand %p50_p6, %p47_p5 }
  0x12   :  { %55 = shalt.err (!%p52_p7)
}
  0x13   :  { %28 = dma.vmem_to_hbm [thread:$0]  %s26_s14, 16, %s94_s2, [#allocation4]  }
  0x14   :  { %56 = dma.done.wait [#allocation4], 16  }
  0x15   :  { %57 = vsyncadd [#allocation4], 4294967280 }
  0x16   :  { %32 = vsyncpa [#allocation4], 1 }

</bundles_post_ra>
